<compile_context>
chip_gen: v5e
topology: v5e:2x2
jax: 0.10.0
libtpu: 0.0.40
codegen_flags: <defaults>
</compile_context>

<pallas_src>
import jax
import jax.numpy as jnp
from jax.experimental import pallas as pl
from jax.experimental.pallas import tpu as pltpu

_LANES = 128
_SUBLANES = 8


def _outconv_vpu_kernel(x_ref, w_ref, b_ref, o_ref):
    """Tiny-channel path: 1x1 conv as dense-slab VPU broadcast FMAs.

    x_ref: (Cin, rows, 128)  VMEM  (sublane+lane dense pixel slabs)
    w_ref: (Cout, Cin)       SMEM  (f32 scalar weights)
    b_ref: (Cout,)           SMEM  (f32 scalar bias)
    o_ref: (Cout, rows, 128) VMEM
    """
    cin = x_ref.shape[0]
    cout = o_ref.shape[0]
    # TODO(synk): optional native-bf16 accumulation on v6e/v7x (keep f32 on v5e).
    for o in range(cout):
        acc = x_ref[0].astype(jnp.float32) * w_ref[o, 0] + b_ref[o]
        for c in range(1, cin):
            acc = acc + x_ref[c].astype(jnp.float32) * w_ref[o, c]
        o_ref[o] = acc.astype(o_ref.dtype)  # dense (rows,128) store, unmasked


def _outconv_mxu_kernel(x_ref, w_ref, b_ref, o_ref, acc_ref):
    """Larger-channel path: (Cout, tk) @ (tk, tn) on the MXU with Cin reduction.

    x_ref: (tk, tn) VMEM, w_ref: (Cout, tk) VMEM, b_ref: (Cout, 1) VMEM,
    o_ref: (Cout, tn) VMEM, acc_ref: (Cout, tn) f32 VMEM scratch.
    """
    k = pl.program_id(2)

    @pl.when(k == 0)
    def _():
        acc_ref[...] = jnp.broadcast_to(
            b_ref[...].astype(jnp.float32), acc_ref.shape)

    acc_ref[...] += jnp.dot(w_ref[...], x_ref[...],
                            preferred_element_type=jnp.float32)

    @pl.when(k == pl.num_programs(2) - 1)
    def _():
        o_ref[...] = acc_ref[...].astype(o_ref.dtype)


def out_conv(x_nchw, weight, bias, *,
             target_block_bytes=2 << 20,      # ~2 MiB x-block (HBM roofline sized)
             vmem_budget_bytes=20 << 20):     # double-buffered tile budget
    """1x1 Conv2d forward (PyTorch OutConv semantics).

    x_nchw : (N, Cin, H, W)
    weight : (Cout, Cin, 1, 1)
    bias   : (Cout,)
    returns: (N, Cout, H, W)
    """
    N, Cin, H, W = x_nchw.shape
    Cout = weight.shape[0]
    HW = H * W
    out_dtype = x_nchw.dtype
    itemsize = jnp.dtype(x_nchw.dtype).itemsize

    w2 = weight.reshape(Cout, Cin)

    # Minimal lane padding only (H*W -> multiple of 128). No tile-sized pad pass.
    hw128 = pl.cdiv(HW, _LANES) * _LANES
    x3 = x_nchw.reshape(N, Cin, HW)
    if hw128 != HW:
        x3 = jnp.pad(x3, ((0, 0), (0, 0), (0, hw128 - HW)))

    cost = pl.CostEstimate(
        flops=2 * N * HW * Cin * Cout,
        transcendentals=0,
        bytes_accessed=N * hw128 * (Cin + Cout) * itemsize
        + (w2.size + bias.size) * 4,
    )

    small_channels = (Cin <= 8 and Cout <= 8) or (Cin * Cout <= 64)

    if small_channels:
        # ---------------- VPU path: dense (rows, 128) pixel slabs ----------------
        R = hw128 // _LANES
        x4 = x3.reshape(N, Cin, R, _LANES)          # free reshape (contiguous)

        rows_target = max(_SUBLANES,
                          target_block_bytes // max(1, Cin * _LANES * itemsize))
        rows_vmem = max(_SUBLANES,
                        vmem_budget_bytes
                        // max(1, 2 * (Cin + Cout) * _LANES * itemsize))
        rows_tile = min(rows_target, rows_vmem, R)
        if N == 1 and R > _SUBLANES:
            # keep >= 2 grid steps so both TensorCores (v7x) get work
            rows_tile = min(rows_tile, pl.cdiv(R, 2))
        if rows_tile < R:
            rows_tile = max(_SUBLANES, (rows_tile // _SUBLANES) * _SUBLANES)
        grid = (N, pl.cdiv(R, rows_tile))           # ragged edge handled by Pallas

        out4 = pl.pallas_call(
            _outconv_vpu_kernel,
            out_shape=jax.ShapeDtypeStruct((N, Cout, R, _LANES), out_dtype),
            grid=grid,
            in_specs=[
                pl.BlockSpec((None, Cin, rows_tile, _LANES),
                             lambda n, r: (n, 0, r, 0)),
                pl.BlockSpec(memory_space=pltpu.MemorySpace.SMEM),   # weights
                pl.BlockSpec(memory_space=pltpu.MemorySpace.SMEM),   # bias
            ],
            out_specs=pl.BlockSpec((None, Cout, rows_tile, _LANES),
                                   lambda n, r: (n, 0, r, 0)),
            compiler_params=pltpu.CompilerParams(
                dimension_semantics=("parallel", "parallel"),
                vmem_limit_bytes=32 << 20,
            ),
            cost_estimate=cost,
        )(x4, w2.astype(jnp.float32), bias.astype(jnp.float32))
        out3 = out4.reshape(N, Cout, hw128)
    else:
        # ---------------- MXU fallback: Cin reduction axis + f32 acc ----------------
        # TODO(synk): add Cout tiling for very large Cout.
        tk = 256 if Cin % 256 == 0 else (128 if Cin % 128 == 0 else Cin)
        per_lane_bytes = 2 * tk * itemsize + 2 * Cout * itemsize + 4 * Cout
        tn = vmem_budget_bytes // max(1, per_lane_bytes)
        tn = max(_LANES, min((tn // _LANES) * _LANES, 1 << 16, hw128))
        grid = (N, pl.cdiv(hw128, tn), Cin // tk)

        out3 = pl.pallas_call(
            _outconv_mxu_kernel,
            out_shape=jax.ShapeDtypeStruct((N, Cout, hw128), out_dtype),
            grid=grid,
            in_specs=[
                pl.BlockSpec((None, tk, tn), lambda n, t, k: (n, k, t)),
                pl.BlockSpec((Cout, tk), lambda n, t, k: (0, k)),
                pl.BlockSpec((Cout, 1), lambda n, t, k: (0, 0)),
            ],
            out_specs=pl.BlockSpec((None, Cout, tn), lambda n, t, k: (n, 0, t)),
            scratch_shapes=[pltpu.VMEM((Cout, tn), jnp.float32)],
            compiler_params=pltpu.CompilerParams(
                dimension_semantics=("parallel", "parallel", "arbitrary"),
                vmem_limit_bytes=32 << 20,
            ),
            cost_estimate=cost,
        )(x3, w2, bias.reshape(Cout, 1).astype(jnp.float32))

    if hw128 != HW:
        out3 = out3[:, :, :HW]
    return out3.reshape(N, Cout, H, W)


if __name__ == "__main__":
    key = jax.random.PRNGKey(0)
    k_x, k_w, k_b = jax.random.split(key, 3)

    N, Cin, H, W = 2, 4, 16, 16
    Cout = 3

    x = jax.random.normal(k_x, (N, Cin, H, W), dtype=jnp.float32)
    # Shapes match nn.Conv2d(Cin, Cout, kernel_size=1)
    weight = jax.random.normal(k_w, (Cout, Cin, 1, 1), dtype=jnp.float32) * 0.1
    bias = jax.random.normal(k_b, (Cout,), dtype=jnp.float32) * 0.1

    y = out_conv(x, weight, bias)
    y = jax.block_until_ready(y)

    # Reference (plain JAX einsum == 1x1 conv semantics)
    y_ref = jnp.einsum("nihw,oi->nohw", x, weight.reshape(Cout, Cin)) \
        + bias[None, :, None, None]
    assert y.shape == (N, Cout, H, W)
    assert jnp.allclose(y, y_ref, atol=1e-5), "mismatch vs reference"

    print("KERNEL_OK")
</pallas_src>

<mosaic_0001>
module attributes {stable_mosaic.version = 11 : i64} {
  func.func @_outconv_vpu_kernel(%arg0: i32, %arg1: i32, %arg2: memref<1x4x2x128xf32, #tpu.memory_space<vmem>>, %arg3: memref<3x4xf32, #tpu.memory_space<smem>>, %arg4: memref<3xf32, #tpu.memory_space<smem>>, %arg5: memref<1x3x2x128xf32, #tpu.memory_space<vmem>>) attributes {dimension_semantics = [#tpu.dimension_semantics<parallel>, #tpu.dimension_semantics<parallel>], iteration_bounds = array<i64: 2, 1>, scalar_prefetch = 0 : i64, scratch_operands = 0 : i64, tpu.core_type = #tpu.core_type<tc>, window_params = [{transform_indices = @transform_0, window_bounds = array<i64: 1, 4, 2, 128>}, {transform_indices = @transform_1, window_bounds = array<i64: 3, 4>}, {transform_indices = @transform_2, window_bounds = array<i64: 3>}, {transform_indices = @transform_3, window_bounds = array<i64: 1, 3, 2, 128>}]} {
    %c0 = arith.constant 0 : index
    %c0_0 = arith.constant 0 : index
    %c0_1 = arith.constant 0 : index
    %c0_2 = arith.constant 0 : index
    %0 = vector.load %arg2[%c0, %c0_0, %c0_1, %c0_2] : memref<1x4x2x128xf32, #tpu.memory_space<vmem>>, vector<1x1x2x128xf32>
    %1 = vector.shape_cast %0 : vector<1x1x2x128xf32> to vector<2x128xf32>
    %c0_3 = arith.constant 0 : index
    %c0_4 = arith.constant 0 : index
    %2 = memref.load %arg3[%c0_3, %c0_4] : memref<3x4xf32, #tpu.memory_space<smem>>
    %3 = vector.broadcast %2 : f32 to vector<2x128xf32>
    %4 = arith.mulf %1, %3 : vector<2x128xf32>
    %c0_5 = arith.constant 0 : index
    %5 = memref.load %arg4[%c0_5] : memref<3xf32, #tpu.memory_space<smem>>
    %6 = vector.broadcast %5 : f32 to vector<2x128xf32>
    %7 = arith.addf %4, %6 : vector<2x128xf32>
    %c0_6 = arith.constant 0 : index
    %c1 = arith.constant 1 : index
    %c0_7 = arith.constant 0 : index
    %c0_8 = arith.constant 0 : index
    %8 = vector.load %arg2[%c0_6, %c1, %c0_7, %c0_8] : memref<1x4x2x128xf32, #tpu.memory_space<vmem>>, vector<1x1x2x128xf32>
    %9 = vector.shape_cast %8 : vector<1x1x2x128xf32> to vector<2x128xf32>
    %c0_9 = arith.constant 0 : index
    %c1_10 = arith.constant 1 : index
    %10 = memref.load %arg3[%c0_9, %c1_10] : memref<3x4xf32, #tpu.memory_space<smem>>
    %11 = vector.broadcast %10 : f32 to vector<2x128xf32>
    %12 = arith.mulf %9, %11 : vector<2x128xf32>
    %13 = arith.addf %7, %12 : vector<2x128xf32>
    %c0_11 = arith.constant 0 : index
    %c2 = arith.constant 2 : index
    %c0_12 = arith.constant 0 : index
    %c0_13 = arith.constant 0 : index
    %14 = vector.load %arg2[%c0_11, %c2, %c0_12, %c0_13] : memref<1x4x2x128xf32, #tpu.memory_space<vmem>>, vector<1x1x2x128xf32>
    %15 = vector.shape_cast %14 : vector<1x1x2x128xf32> to vector<2x128xf32>
    %c0_14 = arith.constant 0 : index
    %c2_15 = arith.constant 2 : index
    %16 = memref.load %arg3[%c0_14, %c2_15] : memref<3x4xf32, #tpu.memory_space<smem>>
    %17 = vector.broadcast %16 : f32 to vector<2x128xf32>
    %18 = arith.mulf %15, %17 : vector<2x128xf32>
    %19 = arith.addf %13, %18 : vector<2x128xf32>
    %c0_16 = arith.constant 0 : index
    %c3 = arith.constant 3 : index
    %c0_17 = arith.constant 0 : index
    %c0_18 = arith.constant 0 : index
    %20 = vector.load %arg2[%c0_16, %c3, %c0_17, %c0_18] : memref<1x4x2x128xf32, #tpu.memory_space<vmem>>, vector<1x1x2x128xf32>
    %21 = vector.shape_cast %20 : vector<1x1x2x128xf32> to vector<2x128xf32>
    %c0_19 = arith.constant 0 : index
    %c3_20 = arith.constant 3 : index
    %22 = memref.load %arg3[%c0_19, %c3_20] : memref<3x4xf32, #tpu.memory_space<smem>>
    %23 = vector.broadcast %22 : f32 to vector<2x128xf32>
    %24 = arith.mulf %21, %23 : vector<2x128xf32>
    %25 = arith.addf %19, %24 : vector<2x128xf32>
    %c0_21 = arith.constant 0 : index
    %c0_22 = arith.constant 0 : index
    %c0_23 = arith.constant 0 : index
    %c0_24 = arith.constant 0 : index
    %26 = vector.load %arg5[%c0_21, %c0_22, %c0_23, %c0_24] : memref<1x3x2x128xf32, #tpu.memory_space<vmem>>, vector<1x1x2x128xf32>
    %27 = vector.shape_cast %26 : vector<1x1x2x128xf32> to vector<2x128xf32>
    %28 = vector.shape_cast %25 : vector<2x128xf32> to vector<1x1x2x128xf32>
    tpu.vector_store %arg5[%c0_21, %c0_22, %c0_23, %c0_24], %28 {strides = array<i32>} : memref<1x3x2x128xf32, #tpu.memory_space<vmem>>, vector<1x1x2x128xf32>,
    %c0_25 = arith.constant 0 : index
    %c0_26 = arith.constant 0 : index
    %c0_27 = arith.constant 0 : index
    %c0_28 = arith.constant 0 : index
    %29 = vector.load %arg2[%c0_25, %c0_26, %c0_27, %c0_28] : memref<1x4x2x128xf32, #tpu.memory_space<vmem>>, vector<1x1x2x128xf32>
    %30 = vector.shape_cast %29 : vector<1x1x2x128xf32> to vector<2x128xf32>
    %c1_29 = arith.constant 1 : index
    %c0_30 = arith.constant 0 : index
    %31 = memref.load %arg3[%c1_29, %c0_30] : memref<3x4xf32, #tpu.memory_space<smem>>
    %32 = vector.broadcast %31 : f32 to vector<2x128xf32>
    %33 = arith.mulf %30, %32 : vector<2x128xf32>
    %c1_31 = arith.constant 1 : index
    %34 = memref.load %arg4[%c1_31] : memref<3xf32, #tpu.memory_space<smem>>
    %35 = vector.broadcast %34 : f32 to vector<2x128xf32>
    %36 = arith.addf %33, %35 : vector<2x128xf32>
    %c0_32 = arith.constant 0 : index
    %c1_33 = arith.constant 1 : index
    %c0_34 = arith.constant 0 : index
    %c0_35 = arith.constant 0 : index
    %37 = vector.load %arg2[%c0_32, %c1_33, %c0_34, %c0_35] : memref<1x4x2x128xf32, #tpu.memory_space<vmem>>, vector<1x1x2x128xf32>
    %38 = vector.shape_cast %37 : vector<1x1x2x128xf32> to vector<2x128xf32>
    %c1_36 = arith.constant 1 : index
    %c1_37 = arith.constant 1 : index
    %39 = memref.load %arg3[%c1_36, %c1_37] : memref<3x4xf32, #tpu.memory_space<smem>>
    %40 = vector.broadcast %39 : f32 to vector<2x128xf32>
    %41 = arith.mulf %38, %40 : vector<2x128xf32>
    %42 = arith.addf %36, %41 : vector<2x128xf32>
    %c0_38 = arith.constant 0 : index
    %c2_39 = arith.constant 2 : index
    %c0_40 = arith.constant 0 : index
    %c0_41 = arith.constant 0 : index
    %43 = vector.load %arg2[%c0_38, %c2_39, %c0_40, %c0_41] : memref<1x4x2x128xf32, #tpu.memory_space<vmem>>, vector<1x1x2x128xf32>
    %44 = vector.shape_cast %43 : vector<1x1x2x128xf32> to vector<2x128xf32>
    %c1_42 = arith.constant 1 : index
    %c2_43 = arith.constant 2 : index
    %45 = memref.load %arg3[%c1_42, %c2_43] : memref<3x4xf32, #tpu.memory_space<smem>>
    %46 = vector.broadcast %45 : f32 to vector<2x128xf32>
    %47 = arith.mulf %44, %46 : vector<2x128xf32>
    %48 = arith.addf %42, %47 : vector<2x128xf32>
    %c0_44 = arith.constant 0 : index
    %c3_45 = arith.constant 3 : index
    %c0_46 = arith.constant 0 : index
    %c0_47 = arith.constant 0 : index
    %49 = vector.load %arg2[%c0_44, %c3_45, %c0_46, %c0_47] : memref<1x4x2x128xf32, #tpu.memory_space<vmem>>, vector<1x1x2x128xf32>
    %50 = vector.shape_cast %49 : vector<1x1x2x128xf32> to vector<2x128xf32>
    %c1_48 = arith.constant 1 : index
    %c3_49 = arith.constant 3 : index
    %51 = memref.load %arg3[%c1_48, %c3_49] : memref<3x4xf32, #tpu.memory_space<smem>>
    %52 = vector.broadcast %51 : f32 to vector<2x128xf32>
    %53 = arith.mulf %50, %52 : vector<2x128xf32>
    %54 = arith.addf %48, %53 : vector<2x128xf32>
    %c0_50 = arith.constant 0 : index
    %c1_51 = arith.constant 1 : index
    %c0_52 = arith.constant 0 : index
    %c0_53 = arith.constant 0 : index
    %55 = vector.load %arg5[%c0_50, %c1_51, %c0_52, %c0_53] : memref<1x3x2x128xf32, #tpu.memory_space<vmem>>, vector<1x1x2x128xf32>
    %56 = vector.shape_cast %55 : vector<1x1x2x128xf32> to vector<2x128xf32>
    %57 = vector.shape_cast %54 : vector<2x128xf32> to vector<1x1x2x128xf32>
    tpu.vector_store %arg5[%c0_50, %c1_51, %c0_52, %c0_53], %57 {strides = array<i32>} : memref<1x3x2x128xf32, #tpu.memory_space<vmem>>, vector<1x1x2x128xf32>,
    %c0_54 = arith.constant 0 : index
    %c0_55 = arith.constant 0 : index
    %c0_56 = arith.constant 0 : index
    %c0_57 = arith.constant 0 : index
    %58 = vector.load %arg2[%c0_54, %c0_55, %c0_56, %c0_57] : memref<1x4x2x128xf32, #tpu.memory_space<vmem>>, vector<1x1x2x128xf32>
    %59 = vector.shape_cast %58 : vector<1x1x2x128xf32> to vector<2x128xf32>
    %c2_58 = arith.constant 2 : index
    %c0_59 = arith.constant 0 : index
    %60 = memref.load %arg3[%c2_58, %c0_59] : memref<3x4xf32, #tpu.memory_space<smem>>
    %61 = vector.broadcast %60 : f32 to vector<2x128xf32>
    %62 = arith.mulf %59, %61 : vector<2x128xf32>
    %c2_60 = arith.constant 2 : index
    %63 = memref.load %arg4[%c2_60] : memref<3xf32, #tpu.memory_space<smem>>
    %64 = vector.broadcast %63 : f32 to vector<2x128xf32>
    %65 = arith.addf %62, %64 : vector<2x128xf32>
    %c0_61 = arith.constant 0 : index
    %c1_62 = arith.constant 1 : index
    %c0_63 = arith.constant 0 : index
    %c0_64 = arith.constant 0 : index
    %66 = vector.load %arg2[%c0_61, %c1_62, %c0_63, %c0_64] : memref<1x4x2x128xf32, #tpu.memory_space<vmem>>, vector<1x1x2x128xf32>
    %67 = vector.shape_cast %66 : vector<1x1x2x128xf32> to vector<2x128xf32>
    %c2_65 = arith.constant 2 : index
    %c1_66 = arith.constant 1 : index
    %68 = memref.load %arg3[%c2_65, %c1_66] : memref<3x4xf32, #tpu.memory_space<smem>>
    %69 = vector.broadcast %68 : f32 to vector<2x128xf32>
    %70 = arith.mulf %67, %69 : vector<2x128xf32>
    %71 = arith.addf %65, %70 : vector<2x128xf32>
    %c0_67 = arith.constant 0 : index
    %c2_68 = arith.constant 2 : index
    %c0_69 = arith.constant 0 : index
    %c0_70 = arith.constant 0 : index
    %72 = vector.load %arg2[%c0_67, %c2_68, %c0_69, %c0_70] : memref<1x4x2x128xf32, #tpu.memory_space<vmem>>, vector<1x1x2x128xf32>
    %73 = vector.shape_cast %72 : vector<1x1x2x128xf32> to vector<2x128xf32>
    %c2_71 = arith.constant 2 : index
    %c2_72 = arith.constant 2 : index
    %74 = memref.load %arg3[%c2_71, %c2_72] : memref<3x4xf32, #tpu.memory_space<smem>>
    %75 = vector.broadcast %74 : f32 to vector<2x128xf32>
    %76 = arith.mulf %73, %75 : vector<2x128xf32>
    %77 = arith.addf %71, %76 : vector<2x128xf32>
    %c0_73 = arith.constant 0 : index
    %c3_74 = arith.constant 3 : index
    %c0_75 = arith.constant 0 : index
    %c0_76 = arith.constant 0 : index
    %78 = vector.load %arg2[%c0_73, %c3_74, %c0_75, %c0_76] : memref<1x4x2x128xf32, #tpu.memory_space<vmem>>, vector<1x1x2x128xf32>
    %79 = vector.shape_cast %78 : vector<1x1x2x128xf32> to vector<2x128xf32>
    %c2_77 = arith.constant 2 : index
    %c3_78 = arith.constant 3 : index
    %80 = memref.load %arg3[%c2_77, %c3_78] : memref<3x4xf32, #tpu.memory_space<smem>>
    %81 = vector.broadcast %80 : f32 to vector<2x128xf32>
    %82 = arith.mulf %79, %81 : vector<2x128xf32>
    %83 = arith.addf %77, %82 : vector<2x128xf32>
    %c0_79 = arith.constant 0 : index
    %c2_80 = arith.constant 2 : index
    %c0_81 = arith.constant 0 : index
    %c0_82 = arith.constant 0 : index
    %84 = vector.load %arg5[%c0_79, %c2_80, %c0_81, %c0_82] : memref<1x3x2x128xf32, #tpu.memory_space<vmem>>, vector<1x1x2x128xf32>
    %85 = vector.shape_cast %84 : vector<1x1x2x128xf32> to vector<2x128xf32>
    %86 = vector.shape_cast %83 : vector<2x128xf32> to vector<1x1x2x128xf32>
    tpu.vector_store %arg5[%c0_79, %c2_80, %c0_81, %c0_82], %86 {strides = array<i32>} : memref<1x3x2x128xf32, #tpu.memory_space<vmem>>, vector<1x1x2x128xf32>,
    return
  }
  func.func @transform_0(%arg0: i32, %arg1: i32) -> (i32, i32, i32, i32) {
    %c0_i32 = arith.constant 0 : i32
    %c0_i32_0 = arith.constant 0 : i32
    %c0_i32_1 = arith.constant 0 : i32
    return %arg0, %c0_i32, %arg1, %c0_i32_0 : i32, i32, i32, i32
  }
  func.func @transform_1(%arg0: i32, %arg1: i32) -> (i32, i32) {
    %c0_i32 = arith.constant 0 : i32
    %c0_i32_0 = arith.constant 0 : i32
    %c0_i32_1 = arith.constant 0 : i32
    return %c0_i32, %c0_i32_0 : i32, i32
  }
  func.func @transform_2(%arg0: i32, %arg1: i32) -> i32 {
    %c0_i32 = arith.constant 0 : i32
    %c0_i32_0 = arith.constant 0 : i32
    return %c0_i32 : i32
  }
  func.func @transform_3(%arg0: i32, %arg1: i32) -> (i32, i32, i32, i32) {
    %c0_i32 = arith.constant 0 : i32
    %c0_i32_0 = arith.constant 0 : i32
    %c0_i32_1 = arith.constant 0 : i32
    return %arg0, %c0_i32, %arg1, %c0_i32_0 : i32, i32, i32, i32
  }
}

</mosaic_0001>

<bundles_post_ra>
// kernel: tpu_custom_call.1
= control target key start
LH: loop header
LB: loop body
LE: loop exit
PB: predicated region body
PF: predicated region fallthrough
CT: control target
= control target key end

     0   :  { %s921_s0 = inlined_call_operand.hbm [shape: f32[2,4,2,128], index: 0, kind: input, shape index: {}]   ;;  %s922_s1 = inlined_call_operand.hbm [shape: f32[3,4], index: 1, kind: input, shape index: {}]   ;;  %s923_s2 = inlined_call_operand.vmem [shape: f32[3], index: 2, kind: input, shape index: {}]   ;;  %s924_s3 = inlined_call_operand.hbm [shape: f32[2,3,2,128], index: 3, kind: output, shape index: {}]  }
   0x1   :  { %925 = sst [smem:[#allocation14_spill]] %s922_s1 }
   0x2   :  { %8 = vsyncpa [#allocation3], 0 }
   0x3   :  { %10 = vsyncpa [#allocation3 + $0x1], 0 }
   0x4   :  { %11 = vsyncpa [#allocation5], 0 }
   0x5   :  { %12 = vsyncpa [#allocation6], 0 }
   0x6   :  { %13 = vsyncpa [#allocation4], 0 }
   0x7   :  { %15 = vsyncpa [#allocation4 + $0x1], 0  ;;  %s743_s12 = smov 0   ;;  %s745_s13 = smov 0  }
   0x8   :  { %s747_s14 = smov 0   ;;  %s749_s15 = smov 0  }
   0x9   :  { %s751_s16 = smov 0   ;;  %s753_s17 = smov 0  }
   0xa LB: > { %s435_s18 = sadd.s32 4294967295, %s715_s17   ;;  %s436_s19 = sadd.s32 4294967294, %s715_s17   ;;  %s715_s17 = sphi %s753_s17, %s21_s17   ;;  %s711_s16 = sphi %s751_s16, %s938_s16   ;;  %s707_s15 = sphi %s749_s15, %s937_s15   ;;  %s703_s14 = sphi %s747_s14, %s936_s14   ;;  %s699_s13 = sphi %s745_s13, %s935_s13   ;;  %s695_s12 = sphi %s743_s12, %s934_s12  }
   0xb   : > { %s42_s20 = sadd.s32 1, %s703_s14  ;;  %p49_p0 = scmp.ne.s32.totalorder %s703_s14, %s699_s13 }
   0xc   : > { %p50_p1 = scmp.eq.s32.totalorder %s715_s17, 0  ;;  %p55_p2 = scmp.ne.s32.totalorder %s699_s13, %s695_s12 }
   0xd   : > { %p781_p3 = scmp.eq.s32.totalorder %s435_s18, 0  ;;  %p123_p4 = scmp.eq.s32.totalorder %s435_s18, 1 }
   0xe   : > { %p785_p5 = por %p50_p1, %p49_p0  ;;  %p129_p6 = scmp.eq.s32.totalorder %s436_s19, 1 }
   0xf   : > { %p791_p7 = por %p781_p3, %p55_p2  ;;  %p795_p8 = por %p123_p4, %p49_p0 }
  0x10   : > { %p799_p9 = por %p129_p6, %p55_p2  ;;  %p437_p10 = scmp.ge.s32.totalorder %s715_s17, 1 }
  0x11   : > { %p136_p11 = scmp.lt.s32.totalorder %s715_s17, 3  ;;  %s931_s1 = sld [smem:[#allocation14_spill]] }
  0x12   : > { %p440_p13 = scmp.ge.s32.totalorder %s715_s17, 2  ;;  %p507_p0 = scmp.lt.s32.totalorder %s715_s17, 2 }
  0x13   : > { %p808_p12 = pnand %p437_p10, %p136_p11  ;;  %s158_s5 = sshll.u32 %s923_s2, 4  ;;  %s159_s5 = int_to_ptr.vmem [resolvable:$true] %s158_s5 }
  0x14   : > { %p821_p2 = pnand %p507_p0, %p785_p5  ;;  %s717_s7 = smov [#allocation7]  }
  0x15   : > { %p490_p1 = pneg %p808_p12  ;;  %s718_s8 = smov [#allocation8]  }
  0x16   : > { %s33_s9 = sadd.s32 1, %s711_s16  ;;  %s169_s10 = sand.u32 1, %s703_s14  }
  0x17   : > { %s148_s28 = sshll.u32 %s931_s1, 4  ;;  %p491_p4 = pnand %p490_p1, %p781_p3  ;;  %s149_s28 = int_to_ptr.hbm [resolvable:$true] %s148_s28 }
  0x18   : > { %p35_p6 = scmp.ge.s32.totalorder %s33_s9, 2  ;;  %s441_s11 = sshll.u32 %s169_s10, 3 }
  0x19   : > { %493 = dma.hbm_to_smem (!%p491_p4), %s149_s28, 64, %s717_s7, [#allocation5]  }
  0x1a   : > { %496 = dma.vmem_to_smem (!%p491_p4), %s159_s5, 16, %s718_s8, [#allocation6]  }
  0x1b   : > { %s475_s18 = sshll.u32 %s711_s16, 3  ;;  %s940_s9 = smov (%p35_p6, %s33_s9), 0 }
  0x1c   : > { %s179_s26 = scalar_lea.hbm %s921_s0, %s475_s18  ;;  %s37_s27 = ssub.s32 %s711_s16, %s940_s9 }
  0x1d   : > { %s180_s30 = sshll.u32 %s179_s26, 4  ;;  %p40_p5 = scmp.eq.s32.totalorder %s37_s27, 0  ;;  %s181_s30 = int_to_ptr.hbm [resolvable:$true] %s180_s30 }
  0x1e   : > { %s173_s28 = scalar_lea.vmem [#allocation2], %s441_s11  ;;  %s170_s7 = scalar_lea.sflag [#allocation3], %s169_s10 }
  0x1f   : > { %s182_s4 = sshll.u32 %s173_s28, 4  ;;  %s719_s8 = smov 32   ;;  %s183_s4 = int_to_ptr.vmem [resolvable:$true] %s182_s4 }
  0x20   : > { %s840_s5 = scalar_select %p40_p5, %s703_s14, %s42_s20  }
  0x21   : > { %s720_s1 = smov 2   ;;  %194 = sbr.rel (%p808_p12) target bundleno = 76 (0x4c), region = 32 }
  0x22   : > { %500 = dma.hbm_to_vmem [thread:$0]  (!%p821_p2), %s181_s30, 128, %s183_s4, %s170_s7, %s719_s8, %s719_s8, %s720_s1  }
  0x23   : > { %s847_s18 = sand.u32 (!%p808_p12), 1, %s699_s13  }
  0x24   : > { %s445_s11 = sshll.u32 (!%p808_p12), %s847_s18, 3  ;;  %s197_s19 = scalar_lea.sflag (!%p808_p12), [#allocation3], %s847_s18 }
  0x25   : > { %s851_s22 = scalar_lea.vmem (!%p808_p12), [#allocation2], %s445_s11 }
  0x26   : > { %678 = dma.done.wait (%p791_p7), %s197_s19, 128  }
  0x27   : > { %680 = vsyncadd (%p791_p7), %s197_s19, 4294967168 }
  0x28   : > { %682 = dma.done.wait (%p781_p3), [#allocation5], 64  }
  0x29   : > { %684 = vsyncadd (%p781_p3), [#allocation5], 4294967232 }
  0x2a   : > { %686 = dma.done.wait (%p781_p3), [#allocation6], 16  }
  0x2b   : > { %688 = vsyncadd (%p781_p3), [#allocation6], 4294967280 }
  0x2c   : > { %216 = sfence }
  0x2d   : > { %s236_s1 = sld [smem:[#allocation7]]  ;;  %v235_v0 = vld [vmem:[%s851_s22] sm:$0x3]  ;;  %v448_v2 = vld [vmem:[%s851_s22 + $0x2] sm:$0x3]  ;;  %s476_s28 = smul.u32 6, %s847_s18 }
  0x2e   : > { %s239_s20 = sld [smem:[#allocation8]]  ;;  %v450_v5 = vld [vmem:[%s851_s22 + $0x4] sm:$0x3]  ;;  %v452_v7 = vld [vmem:[%s851_s22 + $0x6] sm:$0x3] }
  0x2f   : > { %s449_s23 = sld [smem:[#allocation7 + $0x1]]  ;;  %v261_v11 = vld [vmem:[%s851_s22] sm:$0x3]  ;;  %v456_v17 = vld [vmem:[%s851_s22 + $0x2] sm:$0x3] }
  0x30   : > { %s451_s29 = sld [smem:[#allocation7 + $0x2]]  ;;  %v458_v20 = vld [vmem:[%s851_s22 + $0x4] sm:$0x3]  ;;  %v460_v23 = vld [vmem:[%s851_s22 + $0x6] sm:$0x3] }
  0x31   : > { %s453_s6 = sld [smem:[#allocation7 + $0x3]]  ;;  %v285_v27 = vld [vmem:[%s851_s22] sm:$0x3]  ;;  %v465_v34 = vld [vmem:[%s851_s22 + $0x2] sm:$0x3] }
  0x32   : > { %s454_s10 = sld [smem:[#allocation7 + $0x80]]  ;;  %v467_v37 = vld [vmem:[%s851_s22 + $0x4] sm:$0x3]  ;;  %v469_v40 = vld [vmem:[%s851_s22 + $0x6] sm:$0x3]  ;;  %s310_s22 = scalar_lea.sflag [#allocation4], %s847_s18 }
  0x33   : > { %v237_v1 = vstv %s236_s1  ;;  %s455_s26 = sld [smem:[#allocation8 + $0x1]]  ;;  %s477_s1 = smul.u32 6, %s707_s15 }
  0x34   : > { %v238_v3 = vmul.f32 %v237_v1, %v235_v0  ;;  %v240_v4 = vstv %s239_s20  ;;  %s457_s21 = sld [smem:[#allocation7 + $0x81]]  ;;  %s234_s20 = scalar_lea.vmem [#allocation9], %s476_s28 }
  0x35   : > { %v245_v6 = vstv %s449_s23  ;;  %s459_s27 = sld [smem:[#allocation7 + $0x82]]  ;;  %s322_s15 = scalar_lea.hbm %s924_s3, %s477_s1 }
  0x36   : > { %v241_v8 = vadd.f32 %v240_v4, %v238_v3  ;;  %v246_v9 = vmul.f32 %v448_v2, %v245_v6  ;;  %v251_v10 = vstv %s451_s29  ;;  %s461_s30 = sld [smem:[#allocation7 + $0x83]]  ;;  %s645_s28 = scalar_lea.hbm %s924_s3, 12 }
  0x37   : > { %v252_v12 = vmul.f32 %v450_v5, %v251_v10  ;;  %v257_v13 = vstv %s453_s6  ;;  %s463_s4 = sld [smem:[#allocation7 + $0x100]]  ;;  %s323_s6 = sshll.u32 %s234_s20, 4  ;;  %s324_s6 = int_to_ptr.vmem [resolvable:$true] %s323_s6 }
  0x38   : > { %v247_v14 = vadd.f32 %v246_v9, %v241_v8  ;;  %v258_v15 = vmul.f32 %v452_v7, %v257_v13  ;;  %v263_v16 = vstv %s454_s10  ;;  %s872_s7 = sld [smem:[#allocation8 + $0x2]]  ;;  %s325_s10 = sshll.u32 %s322_s15, 4  ;;  %s326_s10 = int_to_ptr.hbm [resolvable:$true] %s325_s10 }
  0x39   : > { %v264_v18 = vmul.f32 %v263_v16, %v261_v11  ;;  %v266_v19 = vstv %s455_s26  ;;  %s466_s8 = sld [smem:[#allocation7 + $0x101]]  ;;  %s639_s26 = sshra.s32 %s326_s10, 4  ;;  %s640_s26 = int_to_ptr.hbm [resolvable:$true] %s639_s26 }
  0x3a   : > { %v253_v21 = vadd.f32 %v252_v12, %v247_v14  ;;  %v270_v22 = vstv %s457_s21  ;;  %s468_s11 = sld [smem:[#allocation7 + $0x102]]  ;;  %s641_s21 = scalar_lea.hbm %s640_s26, 6 }
  0x3b   : > { %v267_v24 = vadd.f32 %v266_v19, %v264_v18  ;;  %v271_v25 = vmul.f32 %v456_v17, %v270_v22  ;;  %v275_v26 = vstv %s459_s27  ;;  %s470_s19 = sld [smem:[#allocation7 + $0x103]]  ;;  %p642_p3 = scmp.ne.s32.totalorder %s640_s26, %s641_s21 }
  0x3c   : > { %v259_v28 = vadd.f32 %v258_v15, %v253_v21  ;;  %v276_v29 = vmul.f32 %v458_v20, %v275_v26  ;;  %v280_v30 = vstv %s461_s30  ;;  %p646_p11 = scmp.lt.s32.totalorder %s640_s26, %s924_s3  ;;  %p647_p12 = scmp.lt.s32.totalorder %s645_s28, %s641_s21 }
  0x3d   : > { %v272_v31 = vadd.f32 %v271_v25, %v267_v24  ;;  %v281_v32 = vmul.f32 %v460_v23, %v280_v30  ;;  %v287_v33 = vstv %s463_s4  ;;  %p643_p7 = pnand %p642_p3, %p795_p8 }
  0x3e   : > { %260 = vst [vmem:[%s234_s20] sm:$0x3] %v259_v28  ;;  %v288_v35 = vmul.f32 %v287_v33, %v285_v27  ;;  %v290_v36 = vstv %s872_s7  ;;  %p648_p0 = por %p647_p12, %p646_p11 }
  0x3f   : > { %v277_v38 = vadd.f32 %v276_v29, %v272_v31  ;;  %v294_v39 = vstv %s466_s8  ;;  %p644_p10 = pneg %p643_p7 }
  0x40   : > { %v291_v41 = vadd.f32 %v290_v36, %v288_v35  ;;  %v295_v42 = vmul.f32 %v465_v34, %v294_v39  ;;  %v299_v43 = vstv %s468_s11 }
  0x41   : > { %v282_v44 = vadd.f32 %v281_v32, %v277_v38  ;;  %v300_v45 = vmul.f32 %v467_v37, %v299_v43  ;;  %v304_v46 = vstv %s470_s19  ;;  %p649_p1 = pnand %p648_p0, %p644_p10 }
  0x42   : > { %v296_v47 = vadd.f32 %v295_v42, %v291_v41  ;;  %v305_v48 = vmul.f32 %v469_v40, %v304_v46 }
  0x43   : > { %462 = vst [vmem:[%s234_s20 + $0x2] sm:$0x3] %v282_v44 }
  0x44   : > { %v301_v49 = vadd.f32 %v300_v45, %v296_v47 }
  0x46   : > { %v306_v50 = vadd.f32 %v305_v48, %v301_v49 }
  0x48   : > { %471 = vst [vmem:[%s234_s20 + $0x4] sm:$0x3] %v306_v50 }
  0x49   : > { %652 = shalt.err (!%p649_p1)
}
  0x4a   : > { %s721_s18 = smov 32   ;;  %s722_s8 = smov 2  }
  0x4b   : > { %488 = dma.vmem_to_hbm [thread:$0]  (%p795_p8), %s324_s6, 96, %s326_s10, %s310_s22, %s721_s18, %s721_s18, %s722_s8  }
  0x4c PF: > { %s340_s11 = sand.u32 1, %s695_s12   ;;  %p502_p2 = pnand %p440_p13, %p799_p9 }
  0x4d   : > { %s341_s19 = scalar_lea.sflag [#allocation4], %s340_s11 }
  0x4e   : > { %p503_p4 = pneg %p502_p2 }
  0x50   : > { %690 = dma.done.wait (%p503_p4), %s341_s19, 96  }
  0x51   : > { %692 = vsyncadd (%p503_p4), %s341_s19, 4294967200  ;;  %s21_s17 = sadd.s32 1, %s715_s17   ;;  %s934_s12 = smov %s699_s13 }
  0x52   : > { %p18_p6 = scmp.ge.s32.totalorder %s21_s17, 4   ;;  %s935_s13 = smov %s703_s14 }
  0x53   : > { %s936_s14 = smov %s840_s5  ;;  %s937_s15 = smov %s711_s16 }
  0x54   : > { %s938_s16 = smov %s940_s9  ;;  %20 = sbr.rel (!%p18_p6) target bundleno = 10 (0xa), region = 92 }
  0x59   :  { %347 = vsyncpa [#allocation3], 1 }
  0x5a   :  { %349 = vsyncpa [#allocation3 + $0x1], 1 }
  0x5b   :  { %350 = vsyncpa [#allocation4], 1 }
  0x5c   :  { %352 = vsyncpa [#allocation4 + $0x1], 1 }
  0x5d   :  { %353 = vsyncpa [#allocation5], 1 }
  0x5e   :  { %355 = vsyncpa [#allocation5 + $0x1], 1 }
  0x5f   :  { %356 = vsyncpa [#allocation6], 1 }
  0x60   :  { %358 = vsyncpa [#allocation6 + $0x1], 1 }

</bundles_post_ra>
